<compile_context>
chip_gen: v7x
topology: tpu7x:2x2x1
jax: 0.10.0
libtpu: 0.0.40
codegen_flags: <defaults>
</compile_context>

<pallas_src>
import jax
import jax.numpy as jnp
from jax.experimental import pallas as pl
from jax.experimental.pallas import tpu as pltpu

IN_DIM = 16
HID1 = 64
HID2 = 128
OUT_CH = 32
T_REPEAT = 601  # time-axis repeat factor from the PyTorch module

_MLP_FLOPS_PER_ROW = 2 * (IN_DIM * HID1 + HID1 * HID2 + HID2 * OUT_CH)


# ----------------------------------------------------------------------------
# Kernels
# ----------------------------------------------------------------------------
def _mlp_body(x_ref, w1_ref, b1_ref, w2_ref, b2_ref, w3_ref, b3_ref):
    """Fused 3-layer MLP + ReLU on one batch tile. Returns (TB, 32) f32."""
    h1 = jnp.dot(x_ref[...], w1_ref[...], preferred_element_type=jnp.float32)
    h1 = jnp.maximum(h1 + b1_ref[...], 0.0)

    h2 = jnp.dot(h1, w2_ref[...], preferred_element_type=jnp.float32)
    h2 = jnp.maximum(h2 + b2_ref[...], 0.0)

    h3 = jnp.dot(h2, w3_ref[...], preferred_element_type=jnp.float32)
    return jnp.maximum(h3 + b3_ref[...], 0.0)


def _listener_mlp_kernel(x_ref, w1_ref, b1_ref, w2_ref, b2_ref, w3_ref, b3_ref,
                         out_ref):
    """Default path: emit only the (TB, 32) features; no time-repeat here."""
    h3 = _mlp_body(x_ref, w1_ref, b1_ref, w2_ref, b2_ref, w3_ref, b3_ref)
    out_ref[...] = h3.astype(out_ref.dtype)


def _listener_stream_kernel(x_ref, w1_ref, b1_ref, w2_ref, b2_ref, w3_ref,
                            b3_ref, out_ref):
    """Streaming path: write the (TB, 32, 601) slab for this batch tile.

    Time is not tiled (601 stays one block per row), so the MLP runs exactly
    once per batch tile — no scratch / pl.when needed. Cast before the
    broadcast so a bf16 output only casts 32 values per row, not 601x that.
    """
    h3 = _mlp_body(x_ref, w1_ref, b1_ref, w2_ref, b2_ref, w3_ref, b3_ref)
    h3 = h3.astype(out_ref.dtype)
    out_ref[...] = jnp.broadcast_to(h3[:, :, None], out_ref.shape)


# ----------------------------------------------------------------------------
# Wrappers
# ----------------------------------------------------------------------------
def _batch_tile(B, cap):
    """Pick the batch tile: as large as `cap` allows, but prefer >= 2 grid
    steps when B permits so ("parallel",) can shard across v7x's 2 TCs."""
    if B <= 8:
        return B  # full-dim block is always legal
    tb = pl.cdiv(pl.cdiv(B, 2), 8) * 8  # ~half the batch, multiple of 8
    return min(tb, cap, B)


def _weight_specs(params):
    # Full-array blocks, revisited at every batch-grid step (tiny: ~54 KiB).
    return [pl.BlockSpec(p.shape, lambda i: (0, 0)) for p in params]


def _weight_bytes(params):
    return sum(int(p.size) * p.dtype.itemsize for p in params)


def _mlp_pallas(audiogram, params, out_dtype):
    B = audiogram.shape[0]
    # Big tile: per-row VMEM is ~0.2 KiB, so even tb=2048 double-buffered is a
    # few MiB; cuts per-grid-step fixed overhead for large B.
    tb = _batch_tile(B, cap=2048)
    nb = pl.cdiv(B, tb)
    out_isize = jnp.dtype(out_dtype).itemsize
    cost = pl.CostEstimate(
        flops=B * _MLP_FLOPS_PER_ROW,
        transcendentals=0,
        bytes_accessed=B * IN_DIM * 4 + _weight_bytes(params)
        + B * OUT_CH * out_isize,
    )
    return pl.pallas_call(
        _listener_mlp_kernel,
        out_shape=jax.ShapeDtypeStruct((B, OUT_CH), out_dtype),
        grid=(nb,),
        in_specs=[pl.BlockSpec((tb, IN_DIM), lambda i: (i, 0))]
        + _weight_specs(params),
        out_specs=pl.BlockSpec((tb, OUT_CH), lambda i: (i, 0)),
        compiler_params=pltpu.CompilerParams(
            dimension_semantics=("parallel",)),
        cost_estimate=cost,
    )(audiogram, *params)


def _stream_pallas(audiogram, params, out_dtype):
    B = audiogram.shape[0]
    # TB=128: out block 128*32*640*4 ~= 10.5 MiB, double-buffered ~= 21 MiB.
    # vmem_limit_bytes=48 MiB covers v5e's 16 MiB scoped default while staying
    # well under every generation's physical VMEM (>= 64 MiB).
    tb = _batch_tile(B, cap=128)
    nb = pl.cdiv(B, tb)
    out_isize = jnp.dtype(out_dtype).itemsize
    cost = pl.CostEstimate(
        flops=B * _MLP_FLOPS_PER_ROW,
        transcendentals=0,
        bytes_accessed=B * IN_DIM * 4 + _weight_bytes(params)
        + B * OUT_CH * T_REPEAT * out_isize,
    )
    return pl.pallas_call(
        _listener_stream_kernel,
        out_shape=jax.ShapeDtypeStruct((B, OUT_CH, T_REPEAT), out_dtype),
        grid=(nb,),
        in_specs=[pl.BlockSpec((tb, IN_DIM), lambda i: (i, 0))]
        + _weight_specs(params),
        out_specs=pl.BlockSpec((tb, OUT_CH, T_REPEAT), lambda i: (i, 0, 0)),
        compiler_params=pltpu.CompilerParams(
            dimension_semantics=("parallel",),
            vmem_limit_bytes=48 * 1024 * 1024),
        cost_estimate=cost,
    )(audiogram, *params)


def listener_feature_extractor(audiogram, params, *,
                               materialize_in_kernel=False,
                               out_dtype=jnp.float32):
    """audiogram: (B, 16) f32 -> (B, 32, 601) (PyTorch forward semantics).

    Default: Pallas kernel computes (B, 32); the 601x repeat stays in the
    wrapper as a lazy/fusable XLA broadcast (preferred — the repeat is pure
    redundancy). materialize_in_kernel=True streams the full (B, 32, 601)
    slab to HBM from inside the kernel; out_dtype=jnp.bfloat16 halves that
    write traffic if the consumer tolerates it.
    """
    if materialize_in_kernel:
        return _stream_pallas(audiogram, params, out_dtype)
    h3 = _mlp_pallas(audiogram, params, out_dtype)
    return jnp.broadcast_to(h3[:, :, None],
                            (audiogram.shape[0], OUT_CH, T_REPEAT))


# ----------------------------------------------------------------------------
# Params / reference / test
# ----------------------------------------------------------------------------
def init_params(key):
    """Deterministic init matching nn.Linear shapes (uniform +-1/sqrt(fan_in))."""
    def linear(key, fan_in, fan_out):
        kw, kb = jax.random.split(key)
        bound = 1.0 / jnp.sqrt(jnp.float32(fan_in))
        w = jax.random.uniform(kw, (fan_in, fan_out), jnp.float32, -bound, bound)
        b = jax.random.uniform(kb, (1, fan_out), jnp.float32, -bound, bound)
        return w, b

    k1, k2, k3 = jax.random.split(key, 3)
    w1, b1 = linear(k1, IN_DIM, HID1)
    w2, b2 = linear(k2, HID1, HID2)
    w3, b3 = linear(k3, HID2, OUT_CH)
    return (w1, b1, w2, b2, w3, b3)


def reference(audiogram, params):
    """Pure-JAX reference for correctness checking."""
    w1, b1, w2, b2, w3, b3 = params
    h = jnp.maximum(audiogram @ w1 + b1, 0.0)
    h = jnp.maximum(h @ w2 + b2, 0.0)
    h = jnp.maximum(h @ w3 + b3, 0.0)
    return jnp.broadcast_to(h[:, :, None],
                            (audiogram.shape[0], OUT_CH, T_REPEAT))


if __name__ == "__main__":
    key = jax.random.PRNGKey(0)
    k_params, k_x1, k_x2 = jax.random.split(key, 3)

    params = init_params(k_params)

    # --- Small batch (module-sized): B=2, single grid step. -----------------
    audiogram = jax.random.normal(k_x1, (2, 16), dtype=jnp.float32)
    ref = reference(audiogram, params)

    out = jax.block_until_ready(listener_feature_extractor(audiogram, params))
    assert out.shape == (2, OUT_CH, T_REPEAT), out.shape
    assert out.dtype == jnp.float32
    assert jnp.allclose(out, ref, atol=1e-5, rtol=1e-5)

    out_stream = jax.block_until_ready(
        listener_feature_extractor(audiogram, params,
                                   materialize_in_kernel=True))
    assert out_stream.shape == (2, OUT_CH, T_REPEAT), out_stream.shape
    assert jnp.allclose(out_stream, ref, atol=1e-5, rtol=1e-5)

    # --- Larger batch: exercises >=2 grid steps + a partial last tile. ------
    audiogram2 = jax.random.normal(k_x2, (20, 16), dtype=jnp.float32)
    ref2 = reference(audiogram2, params)

    out2 = jax.block_until_ready(listener_feature_extractor(audiogram2, params))
    assert out2.shape == (20, OUT_CH, T_REPEAT), out2.shape
    assert jnp.allclose(out2, ref2, atol=1e-5, rtol=1e-5)

    out2_stream = jax.block_until_ready(
        listener_feature_extractor(audiogram2, params,
                                   materialize_in_kernel=True))
    assert jnp.allclose(out2_stream, ref2, atol=1e-5, rtol=1e-5)

    # --- bf16 streaming output option (halved HBM write traffic). -----------
    out2_bf16 = jax.block_until_ready(
        listener_feature_extractor(audiogram2, params,
                                   materialize_in_kernel=True,
                                   out_dtype=jnp.bfloat16))
    assert out2_bf16.dtype == jnp.bfloat16
    assert jnp.allclose(out2_bf16.astype(jnp.float32), ref2,
                        atol=2e-2, rtol=2e-2)

    print("KERNEL_OK")
</pallas_src>

<mosaic_0001>
module attributes {stable_mosaic.version = 11 : i64} {
  func.func @_listener_mlp_kernel(%arg0: i32, %arg1: memref<2x16xf32, #tpu.memory_space<vmem>>, %arg2: memref<16x64xf32, #tpu.memory_space<vmem>>, %arg3: memref<1x64xf32, #tpu.memory_space<vmem>>, %arg4: memref<64x128xf32, #tpu.memory_space<vmem>>, %arg5: memref<1x128xf32, #tpu.memory_space<vmem>>, %arg6: memref<128x32xf32, #tpu.memory_space<vmem>>, %arg7: memref<1x32xf32, #tpu.memory_space<vmem>>, %arg8: memref<2x32xf32, #tpu.memory_space<vmem>>) attributes {dimension_semantics = [#tpu.dimension_semantics<parallel>], iteration_bounds = array<i64: 1>, scalar_prefetch = 0 : i64, scratch_operands = 0 : i64, tpu.core_type = #tpu.core_type<tc>, window_params = [{transform_indices = @transform_0, window_bounds = array<i64: 2, 16>}, {pipeline_mode = #tpu.pipeline_mode<synchronous>, transform_indices = @transform_1, window_bounds = array<i64: 16, 64>}, {pipeline_mode = #tpu.pipeline_mode<synchronous>, transform_indices = @transform_2, window_bounds = array<i64: 1, 64>}, {pipeline_mode = #tpu.pipeline_mode<synchronous>, transform_indices = @transform_3, window_bounds = array<i64: 64, 128>}, {pipeline_mode = #tpu.pipeline_mode<synchronous>, transform_indices = @transform_4, window_bounds = array<i64: 1, 128>}, {pipeline_mode = #tpu.pipeline_mode<synchronous>, transform_indices = @transform_5, window_bounds = array<i64: 128, 32>}, {pipeline_mode = #tpu.pipeline_mode<synchronous>, transform_indices = @transform_6, window_bounds = array<i64: 1, 32>}, {transform_indices = @transform_7, window_bounds = array<i64: 2, 32>}]} {
    %c0 = arith.constant 0 : index
    %c0_0 = arith.constant 0 : index
    %0 = vector.load %arg1[%c0, %c0_0] : memref<2x16xf32, #tpu.memory_space<vmem>>, vector<2x16xf32>
    %c0_1 = arith.constant 0 : index
    %c0_2 = arith.constant 0 : index
    %1 = vector.load %arg2[%c0_1, %c0_2] : memref<16x64xf32, #tpu.memory_space<vmem>>, vector<16x64xf32>
    %cst = arith.constant dense<0.000000e+00> : vector<2x64xf32>
    %2 = tpu.matmul %0, %1, %cst {dimension_numbers = #tpu.dot_dimension_numbers<[1], [0], [0], [1], [0, 0, 1, 1], [], []>} : vector<2x16xf32>, vector<16x64xf32>, vector<2x64xf32> -> vector<2x64xf32>
    %c0_3 = arith.constant 0 : index
    %c0_4 = arith.constant 0 : index
    %3 = vector.load %arg3[%c0_3, %c0_4] : memref<1x64xf32, #tpu.memory_space<vmem>>, vector<1x64xf32>
    %4 = vector.broadcast %3 : vector<1x64xf32> to vector<2x64xf32>
    %5 = arith.addf %2, %4 : vector<2x64xf32>
    %cst_5 = arith.constant 0.000000e+00 : f32
    %6 = vector.broadcast %cst_5 : f32 to vector<2x64xf32>
    %7 = arith.maximumf %5, %6 : vector<2x64xf32>
    %c0_6 = arith.constant 0 : index
    %c0_7 = arith.constant 0 : index
    %8 = vector.load %arg4[%c0_6, %c0_7] : memref<64x128xf32, #tpu.memory_space<vmem>>, vector<64x128xf32>
    %cst_8 = arith.constant dense<0.000000e+00> : vector<2x128xf32>
    %9 = tpu.matmul %7, %8, %cst_8 {dimension_numbers = #tpu.dot_dimension_numbers<[1], [0], [0], [1], [0, 0, 1, 1], [], []>} : vector<2x64xf32>, vector<64x128xf32>, vector<2x128xf32> -> vector<2x128xf32>
    %c0_9 = arith.constant 0 : index
    %c0_10 = arith.constant 0 : index
    %10 = vector.load %arg5[%c0_9, %c0_10] : memref<1x128xf32, #tpu.memory_space<vmem>>, vector<1x128xf32>
    %11 = vector.broadcast %10 : vector<1x128xf32> to vector<2x128xf32>
    %12 = arith.addf %9, %11 : vector<2x128xf32>
    %cst_11 = arith.constant 0.000000e+00 : f32
    %13 = vector.broadcast %cst_11 : f32 to vector<2x128xf32>
    %14 = arith.maximumf %12, %13 : vector<2x128xf32>
    %c0_12 = arith.constant 0 : index
    %c0_13 = arith.constant 0 : index
    %15 = vector.load %arg6[%c0_12, %c0_13] : memref<128x32xf32, #tpu.memory_space<vmem>>, vector<128x32xf32>
    %cst_14 = arith.constant dense<0.000000e+00> : vector<2x32xf32>
    %16 = tpu.matmul %14, %15, %cst_14 {dimension_numbers = #tpu.dot_dimension_numbers<[1], [0], [0], [1], [0, 0, 1, 1], [], []>} : vector<2x128xf32>, vector<128x32xf32>, vector<2x32xf32> -> vector<2x32xf32>
    %c0_15 = arith.constant 0 : index
    %c0_16 = arith.constant 0 : index
    %17 = vector.load %arg7[%c0_15, %c0_16] : memref<1x32xf32, #tpu.memory_space<vmem>>, vector<1x32xf32>
    %18 = vector.broadcast %17 : vector<1x32xf32> to vector<2x32xf32>
    %19 = arith.addf %16, %18 : vector<2x32xf32>
    %cst_17 = arith.constant 0.000000e+00 : f32
    %20 = vector.broadcast %cst_17 : f32 to vector<2x32xf32>
    %21 = arith.maximumf %19, %20 : vector<2x32xf32>
    %c0_18 = arith.constant 0 : index
    %c0_19 = arith.constant 0 : index
    %22 = vector.load %arg8[%c0_18, %c0_19] : memref<2x32xf32, #tpu.memory_space<vmem>>, vector<2x32xf32>
    tpu.vector_store %arg8[%c0_18, %c0_19], %21 {strides = array<i32>} : memref<2x32xf32, #tpu.memory_space<vmem>>, vector<2x32xf32>,
    return
  }
  func.func @transform_0(%arg0: i32) -> (i32, i32) {
    %c0_i32 = arith.constant 0 : i32
    %c0_i32_0 = arith.constant 0 : i32
    return %arg0, %c0_i32 : i32, i32
  }
  func.func @transform_1(%arg0: i32) -> (i32, i32) {
    %c0_i32 = arith.constant 0 : i32
    %c0_i32_0 = arith.constant 0 : i32
    %c0_i32_1 = arith.constant 0 : i32
    return %c0_i32, %c0_i32_0 : i32, i32
  }
  func.func @transform_2(%arg0: i32) -> (i32, i32) {
    %c0_i32 = arith.constant 0 : i32
    %c0_i32_0 = arith.constant 0 : i32
    %c0_i32_1 = arith.constant 0 : i32
    return %c0_i32, %c0_i32_0 : i32, i32
  }
  func.func @transform_3(%arg0: i32) -> (i32, i32) {
    %c0_i32 = arith.constant 0 : i32
    %c0_i32_0 = arith.constant 0 : i32
    %c0_i32_1 = arith.constant 0 : i32
    return %c0_i32, %c0_i32_0 : i32, i32
  }
  func.func @transform_4(%arg0: i32) -> (i32, i32) {
    %c0_i32 = arith.constant 0 : i32
    %c0_i32_0 = arith.constant 0 : i32
    %c0_i32_1 = arith.constant 0 : i32
    return %c0_i32, %c0_i32_0 : i32, i32
  }
  func.func @transform_5(%arg0: i32) -> (i32, i32) {
    %c0_i32 = arith.constant 0 : i32
    %c0_i32_0 = arith.constant 0 : i32
    %c0_i32_1 = arith.constant 0 : i32
    return %c0_i32, %c0_i32_0 : i32, i32
  }
  func.func @transform_6(%arg0: i32) -> (i32, i32) {
    %c0_i32 = arith.constant 0 : i32
    %c0_i32_0 = arith.constant 0 : i32
    %c0_i32_1 = arith.constant 0 : i32
    return %c0_i32, %c0_i32_0 : i32, i32
  }
  func.func @transform_7(%arg0: i32) -> (i32, i32) {
    %c0_i32 = arith.constant 0 : i32
    %c0_i32_0 = arith.constant 0 : i32
    return %arg0, %c0_i32 : i32, i32
  }
}

</mosaic_0001>

<bundles_post_ra>
// kernel: tpu_custom_call.1
= control target key start
LH: loop header
LB: loop body
LE: loop exit
PB: predicated region body
PF: predicated region fallthrough
CT: control target
= control target key end

     0   :  { %v474_v2 = vmov 0.0|0.0   ;;  %vm475_vm0 = vmmov 0   ;;  %v476_v4 = vmov 0.0   ;;  %vm37_vm1 = vcmask 130048   ;;  %s636_s0 = inlined_call_operand.vmem [shape: f32[2,16], index: 0, kind: input, shape index: {}]   ;;  %s637_s1 = inlined_call_operand.vmem [shape: f32[16,64], index: 1, kind: input, shape index: {}]   ;;  %s638_s2 = inlined_call_operand.vmem [shape: f32[1,64], index: 2, kind: input, shape index: {}]   ;;  %s639_s3 = inlined_call_operand.vmem [shape: f32[64,128], index: 3, kind: input, shape index: {}]   ;;  %s640_s4 = inlined_call_operand.vmem [shape: f32[1,128], index: 4, kind: input, shape index: {}]   ;;  %s641_s5 = inlined_call_operand.vmem [shape: f32[128,32], index: 5, kind: input, shape index: {}]   ;;  %s642_s6 = inlined_call_operand.vmem [shape: f32[1,32], index: 6, kind: input, shape index: {}]   ;;  %s643_s7 = inlined_call_operand.hbm [shape: f32[2,32], index: 7, kind: output, shape index: {}]  }
   0x1   :  { %v28_v0 = vld [vmem:[%s637_s1] sm:$0xff]  ;;  %v29_v1 = vld [vmem:[%s637_s1 + $0x8] sm:$0xff]  ;;  %407 = vmatprep.subr.bf16.mxu1 %v474_v2  ;;  %350 = vmatprep.mubr.msk.f32.mxu1 %vm475_vm0, %v476_v4 }
   0x2   :  { %v408_v3 = vpack.c.bf16 %v29_v1, %v28_v0  ;;  %v112_v5 = vld [vmem:[%s639_s3] sm:$0xff]  ;;  %v113_v6 = vld [vmem:[%s639_s3 + $0x8] sm:$0xff]  ;;  %422 = vmatprep.subr.bf16.mxu0 %v474_v2  ;;  %404 = vmatprep.mubr.msk.f32.mxu0 %vm475_vm0, %v476_v4 }
   0x3   :  { %v27_v7 = vld [vmem:[%s636_s0] sm:$0x3]  ;;  %v411_v8 = vpack.c.bf16 %v113_v6, %v112_v5 }
   0x4   :  { %409 = vmatpush3.bf16.msra.mxu1 %v408_v3 }
   0x5   :  { %12 = vsyncpa [#allocation3], 0  ;;  %410 = vmatprep.subr.bf16.mxu1 %v474_v2  ;;  %v114_v9 = vld [vmem:[%s639_s3 + $0x10] sm:$0xff]  ;;  %v115_v10 = vld [vmem:[%s639_s3 + $0x18] sm:$0xff]  ;;  %vm127_vm2 = vcmask 523264   ;;  %s477_s8 = smov [#allocation2]  }
   0x6   :  { %v414_v11 = vpack.c.bf16 %v115_v10, %v114_v9  ;;  %v116_v12 = vld [vmem:[%s639_s3 + $0x20] sm:$0xff]  ;;  %v117_v13 = vld [vmem:[%s639_s3 + $0x28] sm:$0xff]  ;;  %v118_v15 = vld [vmem:[%s639_s3 + $0x30] sm:$0xff]  ;;  %s304_s1 = sshll.u32 %s477_s8, 4  ;;  %vm296_vm3 = vcmask 254976   ;;  %s305_s1 = int_to_ptr.vmem [resolvable:$true] %s304_s1 }
   0x7   :  { %351 = vmatmul.mubr.msk.f32.vlgmr.msra.gmra.mrb[0].mxu1 %vm37_vm1, %v27_v7  ;;  %v417_v14 = vpack.c.bf16 %v117_v13, %v116_v12  ;;  %v119_v16 = vld [vmem:[%s639_s3 + $0x38] sm:$0xff]  ;;  %v202_v18 = vld [vmem:[%s641_s5] sm:$0xff]  ;;  %v203_v19 = vld [vmem:[%s641_s5 + $0x8] sm:$0xff]  ;;  %p455_p1 = scmp.lt.s32.totalorder %s305_s1, %s305_s1 }
   0x8   :  { %412 = vmatpush3.bf16.msra.mxu1 %v411_v8  ;;  %369 = vmatprep.mubr.msk.f32.mxu1 %vm475_vm0, %v476_v4  ;;  %v420_v17 = vpack.c.bf16 %v119_v16, %v118_v15  ;;  %v204_v20 = vld [vmem:[%s641_s5 + $0x10] sm:$0xff]  ;;  %v423_v21 = vpack.c.bf16 %v203_v19, %v202_v18  ;;  %v205_v22 = vld [vmem:[%s641_s5 + $0x18] sm:$0xff]  ;;  %v206_v24 = vld [vmem:[%s641_s5 + $0x20] sm:$0xff] }
   0x9   :  { %413 = vmatprep.subr.bf16.mxu1 %v474_v2  ;;  %v426_v23 = vpack.c.bf16 %v205_v22, %v204_v20  ;;  %v207_v25 = vld [vmem:[%s641_s5 + $0x28] sm:$0xff]  ;;  %v208_v27 = vld [vmem:[%s641_s5 + $0x30] sm:$0xff]  ;;  %v209_v28 = vld [vmem:[%s641_s5 + $0x38] sm:$0xff] }
   0xa   :  { %424 = vmatpush3.bf16.msra.mxu0 %v423_v21  ;;  %v429_v26 = vpack.c.bf16 %v207_v25, %v206_v24  ;;  %v432_v29 = vpack.c.bf16 %v209_v28, %v208_v27  ;;  %v210_v30 = vld [vmem:[%s641_s5 + $0x40] sm:$0xff]  ;;  %v211_v31 = vld [vmem:[%s641_s5 + $0x48] sm:$0xff]  ;;  %v212_v33 = vld [vmem:[%s641_s5 + $0x50] sm:$0xff] }
   0xb   :  { %425 = vmatprep.subr.bf16.mxu0 %v474_v2  ;;  %v435_v32 = vpack.c.bf16 %v211_v31, %v210_v30  ;;  %v213_v34 = vld [vmem:[%s641_s5 + $0x58] sm:$0xff]  ;;  %v214_v36 = vld [vmem:[%s641_s5 + $0x60] sm:$0xff]  ;;  %v215_v37 = vld [vmem:[%s641_s5 + $0x68] sm:$0xff] }
   0xc   :  { %415 = vmatpush3.bf16.msra.mxu1 %v414_v11  ;;  %v438_v35 = vpack.c.bf16 %v213_v34, %v212_v33  ;;  %v441_v38 = vpack.c.bf16 %v215_v37, %v214_v36  ;;  %v312_v39 = vld [vmem:[%s638_s2] ss:$0 sm:$0xff]  ;;  %v216_v44 = vld [vmem:[%s641_s5 + $0x70] sm:$0xff]  ;;  %v217_v45 = vld [vmem:[%s641_s5 + $0x78] sm:$0xff]  ;;  %s450_s5 = scalar_lea.vmem %s305_s1, 32 }
   0xd   :  { %416 = vmatprep.subr.bf16.mxu1 %v474_v2  ;;  %v444_v46 = vpack.c.bf16 %v217_v45, %v216_v44  ;;  %v314_v47 = vld [vmem:[%s640_s4] ss:$0 sm:$0xff]  ;;  %p451_p0 = scmp.ne.s32.totalorder %s305_s1, %s450_s5  ;;  %p456_p2 = scmp.lt.s32.totalorder %s450_s5, %s450_s5 }
   0xe   :  { %427 = vmatpush3.bf16.msra.mxu0 %v426_v23  ;;  %v316_v52 = vld [vmem:[%s642_s6] ss:$0 sm:$0xff] }
   0xf   :  { %428 = vmatprep.subr.bf16.mxu0 %v474_v2  ;;  %p457_p3 = por %p456_p2, %p455_p1 }
  0x10   :  { %418 = vmatpush3.bf16.msra.mxu1 %v417_v14 }
  0x11   :  { %419 = vmatprep.subr.bf16.mxu1 %v474_v2  ;;  %p458_p4 = pnand %p457_p3, %p451_p0 }
  0x12   :  { %430 = vmatpush3.bf16.msra.mxu0 %v429_v26 }
  0x13   :  { %431 = vmatprep.subr.bf16.mxu0 %v474_v2 }
  0x14   :  { %421 = vmatpush3.bf16.msra.mxu1 %v420_v17 }
  0x16   :  { %433 = vmatpush3.bf16.msra.mxu0 %v432_v29 }
  0x17   :  { %434 = vmatprep.subr.bf16.mxu0 %v474_v2 }
  0x1a   :  { %436 = vmatpush3.bf16.msra.mxu0 %v435_v32 }
  0x1b   :  { %437 = vmatprep.subr.bf16.mxu0 %v474_v2 }
  0x1e   :  { %439 = vmatpush3.bf16.msra.mxu0 %v438_v35 }
  0x1f   :  { %440 = vmatprep.subr.bf16.mxu0 %v474_v2 }
  0x22   :  { %442 = vmatpush3.bf16.msra.mxu0 %v441_v38 }
  0x23   :  { %443 = vmatprep.subr.bf16.mxu0 %v474_v2 }
  0x26   :  { %445 = vmatpush3.bf16.msra.mxu0 %v444_v46 }
  0xda   :  { %v107_v40 = vpop.f32.mrb[0].mxu1 }
  0xdb   :  { %v108_v41 = vadd.f32 %v312_v39, %v107_v40  ;;  %v352_v42 = vpop.f32.mrb[1].mxu1 }
  0xdd   :  { %v111_v43 = vmax.f32 %v108_v41, 0.0 }
  0xdf   :  { %370 = vmatmul.mubr.msk.f32.vlgmr.msra.gmra.mrb[2].mxu1 %vm127_vm2, %v111_v43 }
 0x1b2   :  { %v197_v48 = vpop.f32.mrb[2].mxu1 }
 0x1b3   :  { %v198_v49 = vadd.f32 %v314_v47, %v197_v48  ;;  %v371_v50 = vpop.f32.mrb[3].mxu1 }
 0x1b5   :  { %v201_v51 = vmax.f32 %v198_v49, 0.0 }
 0x1b7   :  { %405 = vmatmul.mubr.f32.vlgmr.msra.gmra.mrb[0].mxu0 %v201_v51 }
 0x28a   :  { %v291_v53 = vpop.f32.mrb[0].mxu0 }
 0x28b   :  { %v292_v54 = vadd.f32 %v316_v52, %v291_v53  ;;  %v406_v55 = vpop.f32.mrb[1].mxu0 }
 0x28d   :  { %v295_v56 = vmax.f32 %v292_v54, 0.0 }
 0x28f   :  { %297 = vst.msk [vmem:[#allocation2] sm:$0x3] %vm296_vm3, %v295_v56 }
 0x290   :  { %461 = shalt.err (!%p458_p4)
}
 0x291   :  { %s462_s6 = scalar_lea.hbm %s643_s7, 32 }
 0x292   :  { %p463_p5 = scmp.ne.s32.totalorder %s643_s7, %s462_s6  ;;  %p466_p6 = scmp.lt.u32.totalorder %s462_s6, %s643_s7 }
 0x294   :  { %p468_p7 = pnand %p466_p6, %p463_p5 }
 0x296   :  { %471 = shalt.err (!%p468_p7)
}
 0x297   :  { %307 = dma.vmem_to_hbm [thread:$0]  %s305_s1, 32, %s643_s7, [#allocation3]  }
 0x298   :  { %472 = dma.done.wait [#allocation3], 32  }
 0x299   :  { %473 = vsyncadd [#allocation3], 4294967264 }
 0x29a   :  { %311 = vsyncpa [#allocation3], 1 }

</bundles_post_ra>
